<compile_context>
chip_gen: v7x
topology: tpu7x:2x2x1
jax: 0.10.0
libtpu: 0.0.40
codegen_flags: <defaults>
</compile_context>

<pallas_src>
import functools

import jax
import jax.numpy as jnp
from jax.experimental import pallas as pl
from jax.experimental.pallas import tpu as pltpu


def _round_up(n, m):
    return ((n + m - 1) // m) * m


def _layout(state_size, hidden_size, action_size):
    """Row/col layout of the packed parameter slab.

    Every weight region that contracts over the hidden dimension is padded to
    HP = round_up(H, 128) rows so kernel slices are full-lane / full-sublane
    aligned.  All row offsets are multiples of 8.
    """
    s8 = _round_up(state_size, 8)
    hp = _round_up(hidden_size, 128)
    width = _round_up(max(hidden_size, action_size + 1), 128)
    r_w1 = 0
    r_w2 = s8
    r_w3 = s8 + hp
    r_wh = s8 + 2 * hp
    r_b = s8 + 3 * hp
    rows = r_b + 8
    return dict(r_w1=r_w1, r_w2=r_w2, r_w3=r_w3, r_wh=r_wh, r_b=r_b,
                rows=rows, width=width, hp=hp)


def actor_critic_kernel(x_ref, p_ref, out_ref, *,
                        S, HP, A, W, r_w1, r_w2, r_w3, r_wh, r_b):
    """One batch tile: fc1->fc2->fc3 (BN pre-folded) -> fused heads -> softmax.

    x_ref  : (tile_b, S)   input rows
    p_ref  : (rows, W)     packed, pre-folded, zero-padded parameter slab
    out_ref: (tile_b, W)   lane-dense output: probs in [:, :A], value in [:, A]
    """
    x = x_ref[...]

    # Static, (8,128)-aligned slices of the packed parameter slab.
    w1 = p_ref[r_w1:r_w1 + S, 0:HP]          # (S, HP), zero cols >= H
    w2 = p_ref[r_w2:r_w2 + HP, 0:HP]         # (HP, HP), zero rows/cols >= H
    w3 = p_ref[r_w3:r_w3 + HP, 0:HP]
    wh = p_ref[r_wh:r_wh + HP, :]            # fused action+value head, (HP, W)
    bblk = p_ref[r_b:r_b + 8, :]             # aligned (8, W) bias block
    b1 = bblk[0:1, 0:HP]
    b2 = bblk[1:2, 0:HP]
    b3 = bblk[2:3, 0:HP]
    bh = bblk[3:4, :]

    # Three Linear(+folded BN)+ReLU layers.  Padded columns stay exactly 0
    # (zero weight cols, zero bias, ReLU(0) = 0), so the math is exact.
    h = jnp.maximum(jnp.dot(x, w1, preferred_element_type=jnp.float32) + b1, 0.0)
    h = jnp.maximum(jnp.dot(h, w2, preferred_element_type=jnp.float32) + b2, 0.0)
    h = jnp.maximum(jnp.dot(h, w3, preferred_element_type=jnp.float32) + b3, 0.0)

    # Fused head matmul: cols [0:A] = action logits, col A = value, rest = 0.
    z = jnp.dot(h, wh, preferred_element_type=jnp.float32) + bh      # (tb, W)

    # Masked softmax over the action columns only.  (1, W) mask; broadcast
    # handles the rest (cheap on the VPU).
    col = jax.lax.broadcasted_iota(jnp.int32, (1, W), 1)
    amask = col < A
    logits = jnp.where(amask, z, -1e30)
    m = jnp.max(logits, axis=-1, keepdims=True)
    e = jnp.exp(logits - m)                  # masked cols underflow to exactly 0
    denom = jnp.sum(e, axis=-1, keepdims=True)
    probs = e / denom                        # exact divide: probs sum to 1

    # Single lane-dense store: probs in action lanes, raw z (value / zeros)
    # elsewhere.  Columns > A are exactly 0 because the slab is zero padded.
    out_ref[...] = jnp.where(amask, probs, z).astype(out_ref.dtype)


def pack_params(p, state_size, hidden_size, action_size, eps=1e-5):
    """Fold eval-mode BN into the linears and pack everything into one slab."""
    lay = _layout(state_size, hidden_size, action_size)
    H, A, W = hidden_size, action_size, lay["width"]

    def fold(w, b, gamma, beta, mean, var):
        scale = gamma / jnp.sqrt(var + eps)          # (out,)
        return w * scale[None, :], (b - mean) * scale + beta

    w1f, b1f = fold(p["w1"], p["b1"], p["g1"], p["be1"], p["m1"], p["v1"])
    w2f, b2f = fold(p["w2"], p["b2"], p["g2"], p["be2"], p["m2"], p["v2"])
    w3f, b3f = fold(p["w3"], p["b3"], p["g3"], p["be3"], p["m3"], p["v3"])

    slab = jnp.zeros((lay["rows"], W), jnp.float32)
    slab = slab.at[lay["r_w1"]:lay["r_w1"] + state_size, 0:H].set(w1f)
    slab = slab.at[lay["r_w2"]:lay["r_w2"] + H, 0:H].set(w2f)
    slab = slab.at[lay["r_w3"]:lay["r_w3"] + H, 0:H].set(w3f)
    # fused head weight: action columns then the single value column
    slab = slab.at[lay["r_wh"]:lay["r_wh"] + H, 0:A].set(p["wa"])
    slab = slab.at[lay["r_wh"]:lay["r_wh"] + H, A:A + 1].set(p["wv"])
    # bias block (one aligned 8-row section)
    slab = slab.at[lay["r_b"] + 0, 0:H].set(b1f)
    slab = slab.at[lay["r_b"] + 1, 0:H].set(b2f)
    slab = slab.at[lay["r_b"] + 2, 0:H].set(b3f)
    slab = slab.at[lay["r_b"] + 3, 0:A].set(p["ba"])
    slab = slab.at[lay["r_b"] + 3, A].set(p["bv"][0])
    return slab, lay


def _pick_batch_tile(batch, tile_b):
    """Largest tile <= tile_b, multiple of 8, keeping grid >= 2 when possible."""
    tb = max(8, min(_round_up(tile_b, 8), _round_up(batch, 8)))
    if batch > 8 and pl.cdiv(batch, tb) < 2:
        # Keep both v7x TensorCores busy: split into (at least) two steps.
        tb = max(8, _round_up(pl.cdiv(batch, 2), 8))
    return tb


def actor_critic_forward(x, slab, lay, *, state_size, hidden_size, action_size,
                         tile_b=2048, out_dtype=jnp.float32):
    """Pallas wrapper: 1-D parallel grid over batch tiles; params untiled."""
    batch = x.shape[0]
    S, A = state_size, action_size
    W, HP, rows = lay["width"], lay["hp"], lay["rows"]

    tb = _pick_batch_tile(batch, tile_b)
    grid = pl.cdiv(batch, tb)        # no jnp.pad: partial last block is masked

    kernel = functools.partial(
        actor_critic_kernel, S=S, HP=HP, A=A, W=W,
        r_w1=lay["r_w1"], r_w2=lay["r_w2"], r_w3=lay["r_w3"],
        r_wh=lay["r_wh"], r_b=lay["r_b"])

    # VMEM budget: double-buffered x/out tiles + single-buffered slab + slack.
    slab_bytes = rows * W * 4
    vmem_need = slab_bytes + 2 * tb * S * 4 + 2 * tb * W * 4
    vmem_limit = min(64 * 1024 * 1024, max(2 * vmem_need + (4 << 20), 16 << 20))

    flops = 2 * batch * (S * HP + 2 * HP * HP + HP * W) + 8 * batch * W
    cost = pl.CostEstimate(
        flops=int(flops),
        transcendentals=int(batch * W),
        bytes_accessed=int(batch * (S + W) * 4 + slab_bytes))

    out = pl.pallas_call(
        kernel,
        out_shape=jax.ShapeDtypeStruct((batch, W), out_dtype),
        grid_spec=pltpu.PrefetchScalarGridSpec(
            num_scalar_prefetch=0,
            grid=(grid,),
            in_specs=[
                # batch tile of x
                pl.BlockSpec((tb, S), lambda i: (i, 0)),
                # full parameter slab: invariant block, single-buffered
                pl.BlockSpec((rows, W), lambda i: (0, 0),
                             pipeline_mode=pl.Buffered(1)),
            ],
            out_specs=pl.BlockSpec((tb, W), lambda i: (i, 0)),  # lane-dense
        ),
        compiler_params=pltpu.CompilerParams(
            dimension_semantics=("parallel",),
            vmem_limit_bytes=int(vmem_limit)),
        cost_estimate=cost,
    )(x, slab)

    probs = out[:, :A]
    values = out[:, A:A + 1]
    return probs, values


def init_params(key, state_size, action_size, hidden_size):
    """Deterministic synthetic params: PyTorch-style Linear init + non-trivial
    BN (gamma/beta/running stats) so the eval-mode folding is actually tested."""
    def linear(k, fi, fo):
        kw, kb = jax.random.split(k)
        bound = 1.0 / jnp.sqrt(jnp.float32(fi))
        w = jax.random.uniform(kw, (fi, fo), jnp.float32, -bound, bound)
        b = jax.random.uniform(kb, (fo,), jnp.float32, -bound, bound)
        return w, b

    def bn(k, n):
        kg, kb, km, kv = jax.random.split(k, 4)
        gamma = jax.random.uniform(kg, (n,), jnp.float32, 0.5, 1.5)
        beta = jax.random.uniform(kb, (n,), jnp.float32, -0.5, 0.5)
        mean = jax.random.uniform(km, (n,), jnp.float32, -0.5, 0.5)
        var = jax.random.uniform(kv, (n,), jnp.float32, 0.5, 1.5)
        return gamma, beta, mean, var

    ks = jax.random.split(key, 8)
    w1, b1 = linear(ks[0], state_size, hidden_size)
    g1, be1, m1, v1 = bn(ks[1], hidden_size)
    w2, b2 = linear(ks[2], hidden_size, hidden_size)
    g2, be2, m2, v2 = bn(ks[3], hidden_size)
    w3, b3 = linear(ks[4], hidden_size, hidden_size)
    g3, be3, m3, v3 = bn(ks[5], hidden_size)
    wa, ba = linear(ks[6], hidden_size, action_size)
    wv, bv = linear(ks[7], hidden_size, 1)
    return dict(w1=w1, b1=b1, g1=g1, be1=be1, m1=m1, v1=v1,
                w2=w2, b2=b2, g2=g2, be2=be2, m2=m2, v2=v2,
                w3=w3, b3=b3, g3=g3, be3=be3, m3=m3, v3=v3,
                wa=wa, ba=ba, wv=wv, bv=bv)


def reference_forward(x, p, eps=1e-5):
    """Pure-JAX reference: unfolded eval-mode BN, plain softmax."""
    def bn(y, g, b, m, v):
        return g * (y - m) / jnp.sqrt(v + eps) + b

    h = jax.nn.relu(bn(x @ p["w1"] + p["b1"], p["g1"], p["be1"], p["m1"], p["v1"]))
    h = jax.nn.relu(bn(h @ p["w2"] + p["b2"], p["g2"], p["be2"], p["m2"], p["v2"]))
    h = jax.nn.relu(bn(h @ p["w3"] + p["b3"], p["g3"], p["be3"], p["m3"], p["v3"]))
    probs = jax.nn.softmax(h @ p["wa"] + p["ba"], axis=-1)
    values = h @ p["wv"] + p["bv"]
    return probs, values


if __name__ == "__main__":
    # Small shapes consistent with the module's forward; batch chosen so the
    # grid has 2 steps with a partial (masked) last block.
    batch, state_size, action_size, hidden_size = 200, 16, 8, 32

    key = jax.random.PRNGKey(0)
    kx, kp = jax.random.split(key)
    x = jax.random.normal(kx, (batch, state_size), jnp.float32)
    params = init_params(kp, state_size, action_size, hidden_size)

    slab, lay = pack_params(params, state_size, hidden_size, action_size)
    probs, values = actor_critic_forward(
        x, slab, lay, state_size=state_size, hidden_size=hidden_size,
        action_size=action_size, tile_b=2048)
    probs, values = jax.block_until_ready((probs, values))

    ref_probs, ref_values = reference_forward(x, params)
    assert probs.shape == (batch, action_size)
    assert values.shape == (batch, 1)
    # BN folded exactly + exact softmax divide -> tight tolerances.
    assert jnp.allclose(values, ref_values, atol=1e-4, rtol=1e-4)
    assert jnp.allclose(probs, ref_probs, atol=1e-4, rtol=1e-4)
    assert jnp.allclose(jnp.sum(probs, axis=-1), 1.0, atol=1e-5)

    print("KERNEL_OK")
</pallas_src>

<mosaic_0001>
module attributes {stable_mosaic.version = 11 : i64} {
  func.func @actor_critic_kernel(%arg0: i32, %arg1: memref<104x16xf32, #tpu.memory_space<vmem>>, %arg2: memref<408x128xf32, #tpu.memory_space<vmem>>, %arg3: memref<104x128xf32, #tpu.memory_space<vmem>>) attributes {dimension_semantics = [#tpu.dimension_semantics<parallel>], iteration_bounds = array<i64: 2>, scalar_prefetch = 0 : i64, scratch_operands = 0 : i64, tpu.core_type = #tpu.core_type<tc>, window_params = [{transform_indices = @transform_0, window_bounds = array<i64: 104, 16>}, {pipeline_mode = #tpu.pipeline_mode<synchronous>, transform_indices = @transform_1, window_bounds = array<i64: 408, 128>}, {transform_indices = @transform_2, window_bounds = array<i64: 104, 128>}]} {
    %c0 = arith.constant 0 : index
    %c0_0 = arith.constant 0 : index
    %0 = vector.load %arg1[%c0, %c0_0] : memref<104x16xf32, #tpu.memory_space<vmem>>, vector<104x16xf32>
    %c0_1 = arith.constant 0 : index
    %c0_2 = arith.constant 0 : index
    %1 = vector.load %arg2[%c0_1, %c0_2] : memref<408x128xf32, #tpu.memory_space<vmem>>, vector<16x128xf32>
    %c16 = arith.constant 16 : index
    %c0_3 = arith.constant 0 : index
    %2 = vector.load %arg2[%c16, %c0_3] : memref<408x128xf32, #tpu.memory_space<vmem>>, vector<128x128xf32>
    %c144 = arith.constant 144 : index
    %c0_4 = arith.constant 0 : index
    %3 = vector.load %arg2[%c144, %c0_4] : memref<408x128xf32, #tpu.memory_space<vmem>>, vector<128x128xf32>
    %c272 = arith.constant 272 : index
    %c0_5 = arith.constant 0 : index
    %4 = vector.load %arg2[%c272, %c0_5] : memref<408x128xf32, #tpu.memory_space<vmem>>, vector<128x128xf32>
    %c400 = arith.constant 400 : index
    %c0_6 = arith.constant 0 : index
    %5 = vector.load %arg2[%c400, %c0_6] : memref<408x128xf32, #tpu.memory_space<vmem>>, vector<8x128xf32>
    %6 = vector.extract_strided_slice %5 {offsets = [0, 0], sizes = [1, 128], strides = [1, 1]} : vector<8x128xf32> to vector<1x128xf32>
    %7 = vector.extract_strided_slice %5 {offsets = [1, 0], sizes = [1, 128], strides = [1, 1]} : vector<8x128xf32> to vector<1x128xf32>
    %8 = vector.extract_strided_slice %5 {offsets = [2, 0], sizes = [1, 128], strides = [1, 1]} : vector<8x128xf32> to vector<1x128xf32>
    %9 = vector.extract_strided_slice %5 {offsets = [3, 0], sizes = [1, 128], strides = [1, 1]} : vector<8x128xf32> to vector<1x128xf32>
    %cst = arith.constant dense<0.000000e+00> : vector<104x128xf32>
    %10 = tpu.matmul %0, %1, %cst {dimension_numbers = #tpu.dot_dimension_numbers<[1], [0], [0], [1], [0, 0, 1, 1], [], []>} : vector<104x16xf32>, vector<16x128xf32>, vector<104x128xf32> -> vector<104x128xf32>
    %11 = vector.broadcast %6 : vector<1x128xf32> to vector<104x128xf32>
    %12 = arith.addf %10, %11 : vector<104x128xf32>
    %cst_7 = arith.constant 0.000000e+00 : f32
    %13 = vector.broadcast %cst_7 : f32 to vector<104x128xf32>
    %14 = arith.maximumf %12, %13 : vector<104x128xf32>
    %cst_8 = arith.constant dense<0.000000e+00> : vector<104x128xf32>
    %15 = tpu.matmul %14, %2, %cst_8 {dimension_numbers = #tpu.dot_dimension_numbers<[1], [0], [0], [1], [0, 0, 1, 1], [], []>} : vector<104x128xf32>, vector<128x128xf32>, vector<104x128xf32> -> vector<104x128xf32>
    %16 = vector.broadcast %7 : vector<1x128xf32> to vector<104x128xf32>
    %17 = arith.addf %15, %16 : vector<104x128xf32>
    %cst_9 = arith.constant 0.000000e+00 : f32
    %18 = vector.broadcast %cst_9 : f32 to vector<104x128xf32>
    %19 = arith.maximumf %17, %18 : vector<104x128xf32>
    %cst_10 = arith.constant dense<0.000000e+00> : vector<104x128xf32>
    %20 = tpu.matmul %19, %3, %cst_10 {dimension_numbers = #tpu.dot_dimension_numbers<[1], [0], [0], [1], [0, 0, 1, 1], [], []>} : vector<104x128xf32>, vector<128x128xf32>, vector<104x128xf32> -> vector<104x128xf32>
    %21 = vector.broadcast %8 : vector<1x128xf32> to vector<104x128xf32>
    %22 = arith.addf %20, %21 : vector<104x128xf32>
    %cst_11 = arith.constant 0.000000e+00 : f32
    %23 = vector.broadcast %cst_11 : f32 to vector<104x128xf32>
    %24 = arith.maximumf %22, %23 : vector<104x128xf32>
    %cst_12 = arith.constant dense<0.000000e+00> : vector<104x128xf32>
    %25 = tpu.matmul %24, %4, %cst_12 {dimension_numbers = #tpu.dot_dimension_numbers<[1], [0], [0], [1], [0, 0, 1, 1], [], []>} : vector<104x128xf32>, vector<128x128xf32>, vector<104x128xf32> -> vector<104x128xf32>
    %26 = vector.broadcast %9 : vector<1x128xf32> to vector<104x128xf32>
    %27 = arith.addf %25, %26 : vector<104x128xf32>
    %28 = tpu.iota {dimensions = array<i32: 1>} : vector<1x128xi32>
    %c8_i32 = arith.constant 8 : i32
    %29 = vector.broadcast %c8_i32 : i32 to vector<1x128xi32>
    %30 = arith.cmpi slt, %28, %29 : vector<1x128xi32>
    %cst_13 = arith.constant -1.000000e+30 : f32
    %31 = vector.shape_cast %30 : vector<1x128xi1> to vector<1x128xi1>
    %32 = vector.broadcast %31 : vector<1x128xi1> to vector<104x128xi1>
    %33 = vector.broadcast %cst_13 : f32 to vector<104x128xf32>
    %34 = arith.select %32, %27, %33 : vector<104x128xi1>, vector<104x128xf32>
    %cst_14 = arith.constant dense<0xFF800000> : vector<104xf32>
    %35 = vector.multi_reduction <maximumf>, %34, %cst_14 [1] : vector<104x128xf32> to vector<104xf32>
    %36 = vector.shape_cast %35 : vector<104xf32> to vector<104x1xf32>
    %37 = vector.broadcast %36 : vector<104x1xf32> to vector<104x128xf32>
    %38 = arith.subf %34, %37 : vector<104x128xf32>
    %39 = math.exp %38 : vector<104x128xf32>
    %cst_15 = arith.constant dense<0.000000e+00> : vector<104xf32>
    %40 = vector.multi_reduction <add>, %39, %cst_15 [1] : vector<104x128xf32> to vector<104xf32>
    %41 = vector.shape_cast %40 : vector<104xf32> to vector<104x1xf32>
    %42 = vector.broadcast %41 : vector<104x1xf32> to vector<104x128xf32>
    %43 = arith.divf %39, %42 : vector<104x128xf32>
    %44 = vector.shape_cast %30 : vector<1x128xi1> to vector<1x128xi1>
    %45 = vector.broadcast %44 : vector<1x128xi1> to vector<104x128xi1>
    %46 = arith.select %45, %43, %27 : vector<104x128xi1>, vector<104x128xf32>
    %c0_16 = arith.constant 0 : index
    %c0_17 = arith.constant 0 : index
    %47 = vector.load %arg3[%c0_16, %c0_17] : memref<104x128xf32, #tpu.memory_space<vmem>>, vector<104x128xf32>
    tpu.vector_store %arg3[%c0_16, %c0_17], %46 {strides = array<i32>} : memref<104x128xf32, #tpu.memory_space<vmem>>, vector<104x128xf32>,
    return
  }
  func.func @transform_0(%arg0: i32) -> (i32, i32) {
    %c0_i32 = arith.constant 0 : i32
    %c0_i32_0 = arith.constant 0 : i32
    return %arg0, %c0_i32 : i32, i32
  }
  func.func @transform_1(%arg0: i32) -> (i32, i32) {
    %c0_i32 = arith.constant 0 : i32
    %c0_i32_0 = arith.constant 0 : i32
    %c0_i32_1 = arith.constant 0 : i32
    return %c0_i32, %c0_i32_0 : i32, i32
  }
  func.func @transform_2(%arg0: i32) -> (i32, i32) {
    %c0_i32 = arith.constant 0 : i32
    %c0_i32_0 = arith.constant 0 : i32
    return %arg0, %c0_i32 : i32, i32
  }
}

</mosaic_0001>

<bundles_post_ra>
// kernel: tpu_custom_call.1
= control target key start
LH: loop header
LB: loop body
LE: loop exit
PB: predicated region body
PF: predicated region fallthrough
CT: control target
= control target key end

     0   :  { %7 = vsyncpa [#allocation3], 0  ;;  %s2446_s0 = inlined_call_operand.vmem [shape: f32[200,16], index: 0, kind: input, shape index: {}]   ;;  %s2447_s1 = inlined_call_operand.hbm [shape: f32[408,128], index: 1, kind: input, shape index: {}]   ;;  %s2448_s2 = inlined_call_operand.hbm [shape: f32[200,128], index: 2, kind: output, shape index: {}]  }
   0x1   :  { %8 = vsyncpa [#allocation4], 0 }
   0x2   :  { %10 = vsyncpa [#allocation4 + $0x1], 0  ;;  %s1824_s9 = smov 0   ;;  %s1826_s10 = smov 0  }
   0x3   :  { %s1828_s11 = smov 0   ;;  %s1830_s12 = smov 0  }
   0x4 LB: > { %s1845_s13 = sadd.s32 4294967295, %s1798_s12   ;;  %s1118_s14 = sadd.s32 4294967294, %s1798_s12   ;;  %s1798_s12 = sphi %s1830_s12, %s2463_s12   ;;  %s1794_s11 = sphi %s1828_s11, %s2462_s11   ;;  %s1790_s10 = sphi %s1826_s10, %s2461_s10   ;;  %s1786_s9 = sphi %s1824_s9, %s2460_s9  }
   0x5   : > { %s1849_s15 = sadd.s32 1, %s1798_s12   ;;  %s70_s16 = sadd.s32 1, %s1794_s11 }
   0x6   : > { %s67_s17 = ssub.s32 %s1798_s12, %s1849_s15  ;;  %p80_p0 = scmp.ne.s32.totalorder %s1794_s11, %s1790_s10 }
   0x7   : > { %p68_p1 = scmp.eq.s32.totalorder %s67_s17, 0  ;;  %p81_p2 = scmp.eq.s32.totalorder %s1845_s13, 1 }
   0x8   : > { %p86_p3 = scmp.ne.s32.totalorder %s1790_s10, %s1786_s9  ;;  %p87_p4 = scmp.eq.s32.totalorder %s1118_s14, 1 }
   0x9   : > { %s1860_s18 = scalar_select %p68_p1, %s1794_s11, %s70_s16  }
   0xa   : > { %p1862_p5 = por %p81_p2, %p80_p0  ;;  %p1866_p6 = por %p87_p4, %p86_p3 }
   0xb   : > { %p1119_p7 = scmp.ge.s32.totalorder %s1798_s12, 1  ;;  %p94_p8 = scmp.lt.s32.totalorder %s1798_s12, 3 }
   0xc   : > { %s2451_s19 = scalar_select %p1862_p5, 1, 0 }
   0xd   : > { %s2452_s20 = scalar_select %p1866_p6, 1, 0 }
   0xe   : > { %p2449_p9 = scmp.eq.s32.totalorder %s1845_s13, 0  ;;  %p1873_p10 = pnand %p1119_p7, %p94_p8 }
   0xf   : > { %s1800_s22 = smov [#allocation2]   ;;  %s1704_s27 = scalar_lea.hbm %s2447_s1, 6528 }
  0x10   : > { %s2453_s21 = scalar_select %p1873_p10, 1, 0 }
  0x11   : > { %s106_s23 = sshll.u32 %s1800_s22, 4  ;;  %p1601_p11 = pneg %p1873_p10  ;;  %s107_s23 = int_to_ptr.vmem [resolvable:$true] %s106_s23 }
  0x12   : > { %p1705_p13 = scmp.ne.s32.totalorder %s2447_s1, %s1704_s27  ;;  %p1711_p3 = scmp.lt.u32.totalorder %s1704_s27, %s2447_s1 }
  0x13   : > { %p1881_p12 = pnand %p2449_p9, %p1601_p11 }
  0x15   : > { %p1706_p0 = pneg %p1881_p12 }
  0x17   : > { %p1707_p1 = pnand %p1706_p0, %p1705_p13 }
  0x19   : > { %p1708_p2 = pneg %p1707_p1 }
  0x1b   : > { %p1713_p4 = pnand %p1711_p3, %p1708_p2 }
  0x1d   : > { %1716 = shalt.err (!%p1713_p4)
}
  0x1e   : > { %s1717_s4 = scalar_lea.vmem %s107_s23, 6528  ;;  %p1725_p9 = scmp.lt.s32.totalorder %s107_s23, %s107_s23 }
  0x1f   : > { %p1718_p7 = scmp.ne.s32.totalorder %s107_s23, %s1717_s4  ;;  %p1726_p6 = scmp.lt.s32.totalorder %s1717_s4, %s1717_s4 }
  0x21   : > { %p1720_p8 = pnand %p1718_p7, %p1706_p0  ;;  %p1727_p5 = por %p1726_p6, %p1725_p9 }
  0x23   : > { %p1721_p11 = pneg %p1720_p8 }
  0x25   : > { %p1728_p10 = pnand %p1727_p5, %p1721_p11 }
  0x27   : > { %1731 = shalt.err (!%p1728_p10)
}
  0x28   : > { %s1801_s5 = smov 128   ;;  %s1802_s6 = smov 8  }
  0x29   : > { %1604 = dma.hbm_to_vmem [thread:$0]  (!%p1881_p12), %s2447_s1, 6528, %s107_s23, [#allocation3], %s1801_s5, %s1801_s5, %s1802_s6  }
  0x2a   : > { %p2455_p13 = scmp.ne.s32.totalorder %s2453_s21, 0 }
  0x2b   : > { %p2456_p1 = scmp.eq.s32.totalorder (!%p2455_p13), %s1845_s13, 0 }
  0x2c   : > { %139 = sbr.rel (%p2455_p13) target bundleno = 1314 (0x522), region = 28 }
  0x33   : > { %1777 = dma.done.wait (%p2456_p1), [#allocation3], 6528   ;;  %p2457_p0 = pmov %p2456_p1 }
  0x34   : > { %s1908_s14 = smul.u32 13, %s1845_s13  ;;  %v1803_v0 = vmov 0.0|0.0   ;;  %vm1804_vm0 = vmmov 0   ;;  %v1805_v1 = vmov 0.0   ;;  %v197_v2 = vld [vmem:[#allocation2] sm:$0xff]  ;;  %v198_v3 = vld [vmem:[#allocation2 + $0x8] sm:$0xff] }
  0x35   : > { %1779 = vsyncadd (%p2457_p0), [#allocation3], 4294960768  ;;  %1504 = vmatprep.subr.bf16.mxu0 %v1803_v0  ;;  %1252 = vmatprep.mubr.msk.f32.mxu0 %vm1804_vm0, %v1805_v1  ;;  %v1505_v4 = vpack.c.bf16 %v198_v3, %v197_v2  ;;  %vm252_vm1 = vcmask 130048   ;;  %v199_v6 = vld [vmem:[#allocation2 + $0x10] sm:$0xff]  ;;  %v200_v7 = vld [vmem:[#allocation2 + $0x18] sm:$0xff]  ;;  %s162_s24 = sand.u32 1, %s1790_s10  }
  0x36   : > { %p170_p5 = scmp.lt.s32.totalorder %s1908_s14, 24  ;;  %1507 = vmatprep.subr.bf16.mxu1 %v1803_v0  ;;  %1323 = vmatprep.mubr.msk.f32.mxu1 %vm1804_vm0, %v1805_v1  ;;  %v201_v8 = vld [vmem:[#allocation2 + $0x20] sm:$0xff]  ;;  %v1508_v9 = vpack.c.bf16 %v200_v7, %v199_v6  ;;  %v202_v10 = vld [vmem:[#allocation2 + $0x28] sm:$0xff]  ;;  %v203_v13 = vld [vmem:[#allocation2 + $0x30] sm:$0xff]  ;;  %s1595_s25 = smul.u32 104, %s162_s24 }
  0x37   : > { %1506 = vmatpush3.bf16.msra.mxu0 %v1505_v4  ;;  %v1511_v12 = vpack.c.bf16 %v202_v10, %v201_v8  ;;  %v204_v14 = vld [vmem:[#allocation2 + $0x38] sm:$0xff]  ;;  %v205_v17 = vld [vmem:[#allocation2 + $0x40] sm:$0xff]  ;;  %v206_v18 = vld [vmem:[#allocation2 + $0x48] sm:$0xff]  ;;  %v248_v4 = vlaneseq  ;;  %s2385_s27 = scalar_lea.sflag [#allocation4], %s162_s24  ;;  %p2458_p6 = scmp.ne.s32.totalorder %s2451_s19, 0 }
  0x38   : > { %s171_s16 = scalar_select %p170_p5, %s1908_s14, 24  ;;  %1531 = vmatprep.subr.bf16.mxu0 %v1803_v0  ;;  %1509 = vmatpush3.bf16.msra.mxu1 %v1508_v9  ;;  %v1514_v16 = vpack.c.bf16 %v204_v14, %v203_v13  ;;  %v1517_v20 = vpack.c.bf16 %v206_v18, %v205_v17  ;;  %v207_v21 = vld [vmem:[#allocation2 + $0x50] sm:$0xff]  ;;  %v208_v22 = vld [vmem:[#allocation2 + $0x58] sm:$0xff]  ;;  %v209_v25 = vld [vmem:[#allocation2 + $0x60] sm:$0xff] }
  0x39   : > { %1510 = vmatprep.subr.bf16.mxu1 %v1803_v0  ;;  %v1520_v24 = vpack.c.bf16 %v208_v22, %v207_v21  ;;  %v210_v26 = vld [vmem:[#allocation2 + $0x68] sm:$0xff]  ;;  %v211_v29 = vld [vmem:[#allocation2 + $0x70] sm:$0xff]  ;;  %v212_v30 = vld [vmem:[#allocation2 + $0x78] sm:$0xff]  ;;  %s2320_s26 = scalar_lea.vmem [#allocation5], %s1595_s25  ;;  %s1033_s28 = ssub.s32 (%p2458_p6), 25, %s1908_s14 }
  0x3a   : > { %s1124_s17 = sshll.u32 %s171_s16, 3  ;;  %v1523_v28 = vpack.c.bf16 %v210_v26, %v209_v25  ;;  %v1526_v32 = vpack.c.bf16 %v212_v30, %v211_v29  ;;  %v213_v39 = vld [vmem:[#allocation2 + $0x80] sm:$0xff]  ;;  %v214_v40 = vld [vmem:[#allocation2 + $0x88] sm:$0xff]  ;;  %v215_v42 = vld [vmem:[#allocation2 + $0x90] sm:$0xff]  ;;  %p1034_p9 = scmp.lt.s32.totalorder (%p2458_p6), %s1033_s28, 13 }
  0x3b   : > { %s1921_s23 = scalar_lea.vmem %s2446_s0, %s1124_s17  ;;  %v1529_v41 = vpack.c.bf16 %v214_v40, %v213_v39  ;;  %v216_v43 = vld [vmem:[#allocation2 + $0x98] sm:$0xff]  ;;  %v217_v44 = vld [vmem:[#allocation2 + $0xa0] sm:$0xff]  ;;  %v218_v46 = vld [vmem:[#allocation2 + $0xa8] sm:$0xff] }
  0x3c   : > { %v184_v5 = vld [vmem:[%s1921_s23] sm:$0xff]  ;;  %v185_v11 = vld [vmem:[%s1921_s23 + $0x8] sm:$0xff]  ;;  %v186_v15 = vld [vmem:[%s1921_s23 + $0x10] sm:$0xff]  ;;  %1512 = vmatpush3.bf16.msra.mxu1 %v1511_v12  ;;  %v1532_v45 = vpack.c.bf16 %v216_v43, %v215_v42  ;;  %v1535_v47 = vpack.c.bf16 %v218_v46, %v217_v44 }
  0x3d   : > { %1253 = vmatmul.mubr.msk.f32.vlgmr.msra.gmra.mrb[0].mxu0 %vm252_vm1, %v184_v5  ;;  %1513 = vmatprep.subr.bf16.mxu1 %v1803_v0  ;;  %v187_v19 = vld [vmem:[%s1921_s23 + $0x18] sm:$0xff]  ;;  %v188_v23 = vld [vmem:[%s1921_s23 + $0x20] sm:$0xff]  ;;  %v189_v27 = vld [vmem:[%s1921_s23 + $0x28] sm:$0xff]  ;;  %v1993_v5 = vshrl.u32 %v248_v4, 7 }
  0x3e   : > { %1255 = vmatprep.mubr.msk.f32.mxu0 %vm1804_vm0, %v1805_v1  ;;  %v190_v31 = vld [vmem:[%s1921_s23 + $0x30] sm:$0xff]  ;;  %v191_v33 = vld [vmem:[%s1921_s23 + $0x38] sm:$0xff]  ;;  %v192_v34 = vld [vmem:[%s1921_s23 + $0x40] sm:$0xff]  ;;  %1533 = vmatpush3.bf16.msra.mxu0 %v1532_v45 }
  0x3f   : > { %v193_v35 = vld [vmem:[%s1921_s23 + $0x48] sm:$0xff]  ;;  %v194_v36 = vld [vmem:[%s1921_s23 + $0x50] sm:$0xff]  ;;  %v195_v37 = vld [vmem:[%s1921_s23 + $0x58] sm:$0xff]  ;;  %1534 = vmatprep.subr.bf16.mxu0 %v1803_v0  ;;  %v250_v6 = vsub.s32 0, %v1993_v5 }
  0x40   : > { %1515 = vmatpush3.bf16.msra.mxu1 %v1514_v16  ;;  %v196_v38 = vld [vmem:[%s1921_s23 + $0x60] sm:$0xff]  ;;  %v219_v48 = vld [vmem:[#allocation2 + $0xb0] sm:$0xff]  ;;  %v220_v49 = vld [vmem:[#allocation2 + $0xb8] sm:$0xff] }
  0x41   : > { %1256 = vmatmul.mubr.msk.f32.gmra.mrb[2].mxu0 %vm252_vm1, %v185_v11  ;;  %1516 = vmatprep.subr.bf16.mxu1 %v1803_v0  ;;  %v1538_v50 = vpack.c.bf16 %v220_v49, %v219_v48  ;;  %v221_v51 = vld [vmem:[#allocation2 + $0xc0] sm:$0xff]  ;;  %v222_v52 = vld [vmem:[#allocation2 + $0xc8] sm:$0xff]  ;;  %v223_v54 = vld [vmem:[#allocation2 + $0xd0] sm:$0xff] }
  0x42   : > { %1258 = vmatprep.mubr.msk.f32.mxu0 %vm1804_vm0, %v1805_v1  ;;  %1536 = vmatpush3.bf16.msra.mxu0 %v1535_v47  ;;  %v1541_v53 = vpack.c.bf16 %v222_v52, %v221_v51  ;;  %v224_v55 = vld [vmem:[#allocation2 + $0xd8] sm:$0xff]  ;;  %v225_v57 = vld [vmem:[#allocation2 + $0xe0] sm:$0xff]  ;;  %v226_v58 = vld [vmem:[#allocation2 + $0xe8] sm:$0xff] }
  0x43   : > { %1537 = vmatprep.subr.bf16.mxu0 %v1803_v0  ;;  %v1544_v56 = vpack.c.bf16 %v224_v55, %v223_v54  ;;  %v1547_v59 = vpack.c.bf16 %v226_v58, %v225_v57  ;;  %v227_v60 = vld [vmem:[#allocation2 + $0xf0] sm:$0xff]  ;;  %v228_v61 = vld [vmem:[#allocation2 + $0xf8] sm:$0xff]  ;;  %v229_v63 = vld [vmem:[#allocation2 + $0x100] sm:$0xff] }
  0x44   : > { %1518 = vmatpush3.bf16.msra.mxu1 %v1517_v20  ;;  %v1550_v62 = vpack.c.bf16 %v228_v61, %v227_v60  ;;  %v230_v2 = vld [vmem:[#allocation2 + $0x108] sm:$0xff]  ;;  %v1996_v7 = vld [vmem:[#allocation2 + $0x190] sm:$0xff] }
  0x45   : > { %1259 = vmatmul.mubr.msk.f32.gmra.mrb[4].mxu0 %vm252_vm1, %v186_v15  ;;  %1519 = vmatprep.subr.bf16.mxu1 %v1803_v0  ;;  %v1553_v3 = vpack.c.bf16 %v230_v2, %v229_v63  ;;  %v1999_v8 = vrot.slane %v1996_v7, %v250_v6  ;;  %v231_v61 = vld [vmem:[#allocation2 + $0x110] sm:$0xff]  ;;  %v233_v2 = vld [vmem:[#allocation2 + $0x120] sm:$0xff] }
  0x46   : > { %1261 = vmatprep.mubr.msk.f32.mxu0 %vm1804_vm0, %v1805_v1  ;;  %1539 = vmatpush3.bf16.msra.mxu0 %v1538_v50 }
  0x47   : > { %1540 = vmatprep.subr.bf16.mxu0 %v1803_v0 }
  0x48   : > { %1521 = vmatpush3.bf16.msra.mxu1 %v1520_v24 }
  0x49   : > { %1262 = vmatmul.mubr.msk.f32.gmra.mrb[6].mxu0 %vm252_vm1, %v187_v19  ;;  %1522 = vmatprep.subr.bf16.mxu1 %v1803_v0 }
  0x4a   : > { %1264 = vmatprep.mubr.msk.f32.mxu0 %vm1804_vm0, %v1805_v1  ;;  %1542 = vmatpush3.bf16.msra.mxu0 %v1541_v53 }
  0x4b   : > { %1543 = vmatprep.subr.bf16.mxu0 %v1803_v0 }
  0x4c   : > { %1524 = vmatpush3.bf16.msra.mxu1 %v1523_v28 }
  0x4d   : > { %1265 = vmatmul.mubr.msk.f32.gmra.mrb[8].mxu0 %vm252_vm1, %v188_v23  ;;  %1525 = vmatprep.subr.bf16.mxu1 %v1803_v0 }
  0x4e   : > { %1267 = vmatprep.mubr.msk.f32.mxu0 %vm1804_vm0, %v1805_v1  ;;  %1545 = vmatpush3.bf16.msra.mxu0 %v1544_v56 }
  0x4f   : > { %1546 = vmatprep.subr.bf16.mxu0 %v1803_v0 }
  0x50   : > { %1527 = vmatpush3.bf16.msra.mxu1 %v1526_v32 }
  0x51   : > { %1268 = vmatmul.mubr.msk.f32.gmra.mrb[10].mxu0 %vm252_vm1, %v189_v27  ;;  %1528 = vmatprep.subr.bf16.mxu1 %v1803_v0 }
  0x52   : > { %1270 = vmatprep.mubr.msk.f32.mxu0 %vm1804_vm0, %v1805_v1  ;;  %1548 = vmatpush3.bf16.msra.mxu0 %v1547_v59 }
  0x53   : > { %1549 = vmatprep.subr.bf16.mxu0 %v1803_v0 }
  0x54   : > { %1530 = vmatpush3.bf16.msra.mxu1 %v1529_v41 }
  0x55   : > { %1271 = vmatmul.mubr.msk.f32.gmra.mrb[12].mxu0 %vm252_vm1, %v190_v31  ;;  %1579 = vmatprep.subr.bf16.mxu1 %v1803_v0 }
  0x56   : > { %1273 = vmatprep.mubr.msk.f32.mxu0 %vm1804_vm0, %v1805_v1  ;;  %1551 = vmatpush3.bf16.msra.mxu0 %v1550_v62  ;;  %v232_v62 = vld [vmem:[#allocation2 + $0x118] sm:$0xff] }
  0x57   : > { %1552 = vmatprep.subr.bf16.mxu0 %v1803_v0  ;;  %v1556_v63 = vpack.c.bf16 %v232_v62, %v231_v61 }
  0x59   : > { %1274 = vmatmul.mubr.msk.f32.gmra.mrb[14].mxu0 %vm252_vm1, %v191_v33 }
  0x5a   : > { %1276 = vmatprep.mubr.msk.f32.mxu0 %vm1804_vm0, %v1805_v1  ;;  %1554 = vmatpush3.bf16.msra.mxu0 %v1553_v3  ;;  %v234_v3 = vld [vmem:[#allocation2 + $0x128] sm:$0xff] }
  0x5b   : > { %1555 = vmatprep.subr.bf16.mxu0 %v1803_v0  ;;  %v1559_v6 = vpack.c.bf16 %v234_v3, %v233_v2 }
  0x5d   : > { %1277 = vmatmul.mubr.msk.f32.gmra.mrb[16].mxu0 %vm252_vm1, %v192_v34 }
  0x5e   : > { %1279 = vmatprep.mubr.msk.f32.mxu0 %vm1804_vm0, %v1805_v1 }
  0x61   : > { %1280 = vmatmul.mubr.msk.f32.gmra.mrb[18].mxu0 %vm252_vm1, %v193_v35 }
  0x62   : > { %1282 = vmatprep.mubr.msk.f32.mxu0 %vm1804_vm0, %v1805_v1 }
  0x65   : > { %1283 = vmatmul.mubr.msk.f32.gmra.mrb[20].mxu0 %vm252_vm1, %v194_v36 }
  0x66   : > { %1285 = vmatprep.mubr.msk.f32.mxu0 %vm1804_vm0, %v1805_v1 }
  0x69   : > { %1286 = vmatmul.mubr.msk.f32.gmra.mrb[22].mxu0 %vm252_vm1, %v195_v37 }
  0x6a   : > { %1288 = vmatprep.mubr.msk.f32.mxu0 %vm1804_vm0, %v1805_v1 }
  0x6d   : > { %1289 = vmatmul.mubr.msk.f32.gmra.mrb[24].mxu0 %vm252_vm1, %v196_v38 }
  0x6e   : > { %1394 = vmatprep.mubr.msk.f32.mxu0 %vm1804_vm0, %v1805_v1 }
 0x110   : > { %v358_v9 = vpop.f32.mrb[0].mxu0 }
 0x111   : > { %v359_v10 = vadd.f32 %v358_v9, %v1999_v8  ;;  %v1254_v11 = vpop.f32.mrb[1].mxu0  ;;  %v236_v9 = vld [vmem:[#allocation2 + $0x138] sm:$0xff] }
 0x112   : > { %v237_v11 = vld [vmem:[#allocation2 + $0x140] sm:$0xff] }
 0x113   : > { %v422_v12 = vmax.f32 %v359_v10, 0.0 }
 0x114   : > { %v363_v13 = vpop.f32.mrb[2].mxu0 }
 0x115   : > { %v364_v14 = vadd.f32 %v363_v13, %v1999_v8  ;;  %v1257_v15 = vpop.f32.mrb[3].mxu0  ;;  %1324 = vmatmul.mubr.f32.vlgmr.msra.gmra.mrb[0].mxu1 %v422_v12  ;;  %v238_v12 = vld [vmem:[#allocation2 + $0x148] sm:$0xff] }
 0x116   : > { %1326 = vmatprep.mubr.msk.f32.mxu1 %vm1804_vm0, %v1805_v1  ;;  %1587 = vmatpush3.bf16.msra.mxu1 %v1556_v63  ;;  %v1565_v13 = vpack.c.bf16 %v238_v12, %v237_v11  ;;  %v240_v15 = vld [vmem:[#allocation2 + $0x158] sm:$0xff] }
 0x117   : > { %v423_v16 = vmax.f32 %v364_v14, 0.0  ;;  %1580 = vmatprep.subr.bf16.mxu1 %v1803_v0  ;;  %v239_v14 = vld [vmem:[#allocation2 + $0x150] sm:$0xff] }
 0x118   : > { %v368_v17 = vpop.f32.mrb[4].mxu0 }
 0x119   : > { %v369_v18 = vadd.f32 %v368_v17, %v1999_v8  ;;  %v1260_v19 = vpop.f32.mrb[5].mxu0  ;;  %1327 = vmatmul.mubr.f32.gmra.mrb[2].mxu1 %v423_v16  ;;  %v1568_v16 = vpack.c.bf16 %v240_v15, %v239_v14  ;;  %v241_v17 = vld [vmem:[#allocation2 + $0x160] sm:$0xff] }
 0x11a   : > { %1329 = vmatprep.mubr.msk.f32.mxu1 %vm1804_vm0, %v1805_v1  ;;  %1588 = vmatpush3.bf16.msra.mxu1 %v1559_v6 }
 0x11b   : > { %v424_v20 = vmax.f32 %v369_v18, 0.0  ;;  %1581 = vmatprep.subr.bf16.mxu1 %v1803_v0  ;;  %v242_v18 = vld [vmem:[#allocation2 + $0x168] sm:$0xff] }
 0x11c   : > { %v373_v21 = vpop.f32.mrb[6].mxu0  ;;  %v1571_v19 = vpack.c.bf16 %v242_v18, %v241_v17  ;;  %v245_v17 = vld [vmem:[#allocation2 + $0x180] sm:$0xff]  ;;  %v246_v18 = vld [vmem:[#allocation2 + $0x188] sm:$0xff] }
 0x11d   : > { %v374_v22 = vadd.f32 %v373_v21, %v1999_v8  ;;  %v1263_v23 = vpop.f32.mrb[7].mxu0  ;;  %1330 = vmatmul.mubr.f32.gmra.mrb[4].mxu1 %v424_v20  ;;  %v243_v20 = vld [vmem:[#allocation2 + $0x170] sm:$0xff]  ;;  %v244_v21 = vld [vmem:[#allocation2 + $0x178] sm:$0xff] }
 0x11e   : > { %1332 = vmatprep.mubr.msk.f32.mxu1 %vm1804_vm0, %v1805_v1  ;;  %v437_v23 = vsub.s32 1, %v1993_v5 }
 0x11f   : > { %v425_v24 = vmax.f32 %v374_v22, 0.0  ;;  %v1574_v22 = vpack.c.bf16 %v244_v21, %v243_v20  ;;  %v584_v20 = vsub.s32 2, %v1993_v5 }
 0x120   : > { %v378_v25 = vpop.f32.mrb[8].mxu0 }
 0x121   : > { %v379_v26 = vadd.f32 %v378_v25, %v1999_v8  ;;  %v1266_v27 = vpop.f32.mrb[9].mxu0  ;;  %1333 = vmatmul.mubr.f32.gmra.mrb[6].mxu1 %v425_v24  ;;  %v2049_v24 = vrot.slane %v1996_v7, %v437_v23  ;;  %v2099_v21 = vrot.slane %v1996_v7, %v584_v20 }
 0x122   : > { %1335 = vmatprep.mubr.msk.f32.mxu1 %vm1804_vm0, %v1805_v1 }
 0x123   : > { %v426_v28 = vmax.f32 %v379_v26, 0.0 }
 0x124   : > { %v383_v29 = vpop.f32.mrb[10].mxu0 }
 0x125   : > { %v384_v30 = vadd.f32 %v383_v29, %v1999_v8  ;;  %v1269_v31 = vpop.f32.mrb[11].mxu0  ;;  %1336 = vmatmul.mubr.f32.gmra.mrb[8].mxu1 %v426_v28 }
 0x126   : > { %1338 = vmatprep.mubr.msk.f32.mxu1 %vm1804_vm0, %v1805_v1 }
 0x127   : > { %v427_v32 = vmax.f32 %v384_v30, 0.0 }
 0x128   : > { %v388_v33 = vpop.f32.mrb[12].mxu0 }
 0x129   : > { %v389_v34 = vadd.f32 %v388_v33, %v1999_v8  ;;  %v1272_v35 = vpop.f32.mrb[13].mxu0  ;;  %1339 = vmatmul.mubr.f32.gmra.mrb[10].mxu1 %v427_v32 }
 0x12a   : > { %1341 = vmatprep.mubr.msk.f32.mxu1 %vm1804_vm0, %v1805_v1 }
 0x12b   : > { %v428_v36 = vmax.f32 %v389_v34, 0.0 }
 0x12c   : > { %v393_v37 = vpop.f32.mrb[14].mxu0 }
 0x12d   : > { %v394_v38 = vadd.f32 %v393_v37, %v1999_v8  ;;  %v1275_v39 = vpop.f32.mrb[15].mxu0  ;;  %1342 = vmatmul.mubr.f32.gmra.mrb[12].mxu1 %v428_v36 }
 0x12e   : > { %1344 = vmatprep.mubr.msk.f32.mxu1 %vm1804_vm0, %v1805_v1 }
 0x12f   : > { %v429_v40 = vmax.f32 %v394_v38, 0.0 }
 0x130   : > { %v398_v41 = vpop.f32.mrb[16].mxu0 }
 0x131   : > { %v399_v42 = vadd.f32 %v398_v41, %v1999_v8  ;;  %v1278_v43 = vpop.f32.mrb[17].mxu0  ;;  %1345 = vmatmul.mubr.f32.gmra.mrb[14].mxu1 %v429_v40 }
 0x132   : > { %1347 = vmatprep.mubr.msk.f32.mxu1 %vm1804_vm0, %v1805_v1 }
 0x133   : > { %v430_v44 = vmax.f32 %v399_v42, 0.0 }
 0x134   : > { %v403_v45 = vpop.f32.mrb[18].mxu0 }
 0x135   : > { %v404_v46 = vadd.f32 %v403_v45, %v1999_v8  ;;  %v1281_v47 = vpop.f32.mrb[19].mxu0  ;;  %1348 = vmatmul.mubr.f32.gmra.mrb[16].mxu1 %v430_v44 }
 0x136   : > { %1350 = vmatprep.mubr.msk.f32.mxu1 %vm1804_vm0, %v1805_v1 }
 0x137   : > { %v431_v48 = vmax.f32 %v404_v46, 0.0 }
 0x138   : > { %v408_v49 = vpop.f32.mrb[20].mxu0 }
 0x139   : > { %v409_v50 = vadd.f32 %v408_v49, %v1999_v8  ;;  %v1284_v51 = vpop.f32.mrb[21].mxu0  ;;  %1351 = vmatmul.mubr.f32.gmra.mrb[18].mxu1 %v431_v48 }
 0x13a   : > { %1353 = vmatprep.mubr.msk.f32.mxu1 %vm1804_vm0, %v1805_v1 }
 0x13b   : > { %v432_v52 = vmax.f32 %v409_v50, 0.0 }
 0x13c   : > { %v413_v53 = vpop.f32.mrb[22].mxu0 }
 0x13d   : > { %v414_v54 = vadd.f32 %v413_v53, %v1999_v8  ;;  %v1287_v55 = vpop.f32.mrb[23].mxu0  ;;  %1354 = vmatmul.mubr.f32.gmra.mrb[20].mxu1 %v432_v52 }
 0x13e   : > { %1356 = vmatprep.mubr.msk.f32.mxu1 %vm1804_vm0, %v1805_v1 }
 0x13f   : > { %v433_v56 = vmax.f32 %v414_v54, 0.0 }
 0x140   : > { %v418_v57 = vpop.f32.mrb[24].mxu0 }
 0x141   : > { %v419_v58 = vadd.f32 %v418_v57, %v1999_v8  ;;  %v1290_v59 = vpop.f32.mrb[25].mxu0  ;;  %1357 = vmatmul.mubr.f32.gmra.mrb[22].mxu1 %v433_v56  ;;  %v235_v8 = vld [vmem:[#allocation2 + $0x130] sm:$0xff] }
 0x142   : > { %1359 = vmatprep.mubr.msk.f32.mxu1 %vm1804_vm0, %v1805_v1  ;;  %v1562_v10 = vpack.c.bf16 %v236_v9, %v235_v8 }
 0x143   : > { %v434_v60 = vmax.f32 %v419_v58, 0.0 }
 0x144   : > { %1589 = vmatpush3.bf16.msra.mxu1 %v1562_v10 }
 0x145   : > { %1360 = vmatmul.mubr.f32.gmra.mrb[24].mxu1 %v434_v60  ;;  %1582 = vmatprep.subr.bf16.mxu1 %v1803_v0 }
 0x146   : > { %1474 = vmatprep.mubr.msk.f32.mxu1 %vm1804_vm0, %v1805_v1 }
 0x148   : > { %1590 = vmatpush3.bf16.msra.mxu1 %v1565_v13 }
 0x149   : > { %1583 = vmatprep.subr.bf16.mxu1 %v1803_v0 }
 0x14c   : > { %1591 = vmatpush3.bf16.msra.mxu1 %v1568_v16 }
 0x14d   : > { %1584 = vmatprep.subr.bf16.mxu1 %v1803_v0 }
 0x150   : > { %1592 = vmatpush3.bf16.msra.mxu1 %v1571_v19 }
 0x151   : > { %1585 = vmatprep.subr.bf16.mxu1 %v1803_v0 }
 0x154   : > { %1593 = vmatpush3.bf16.msra.mxu1 %v1574_v22 }
 0x155   : > { %1586 = vmatprep.subr.bf16.mxu1 %v1803_v0 }
 0x1e8   : > { %v505_v25 = vpop.f32.mrb[0].mxu1 }
 0x1e9   : > { %v506_v26 = vadd.f32 %v505_v25, %v2049_v24  ;;  %v1325_v27 = vpop.f32.mrb[1].mxu1 }
 0x1eb   : > { %v569_v28 = vmax.f32 %v506_v26, 0.0 }
 0x1ec   : > { %v510_v29 = vpop.f32.mrb[2].mxu1 }
 0x1ed   : > { %v511_v30 = vadd.f32 %v510_v29, %v2049_v24  ;;  %v1328_v31 = vpop.f32.mrb[3].mxu1  ;;  %1395 = vmatmul.mubr.f32.vlgmr.msra.gmra.mrb[26].mxu0 %v569_v28 }
 0x1ee   : > { %1397 = vmatprep.mubr.msk.f32.mxu0 %vm1804_vm0, %v1805_v1  ;;  %1557 = vmatpush3.bf16.msra.mxu0 %v1556_v63 }
 0x1ef   : > { %v570_v32 = vmax.f32 %v511_v30, 0.0  ;;  %1558 = vmatprep.subr.bf16.mxu0 %v1803_v0 }
 0x1f0   : > { %v515_v33 = vpop.f32.mrb[4].mxu1 }
 0x1f1   : > { %v516_v34 = vadd.f32 %v515_v33, %v2049_v24  ;;  %v1331_v35 = vpop.f32.mrb[5].mxu1  ;;  %1398 = vmatmul.mubr.f32.gmra.mrb[28].mxu0 %v570_v32 }
 0x1f2   : > { %1400 = vmatprep.mubr.msk.f32.mxu0 %vm1804_vm0, %v1805_v1  ;;  %1560 = vmatpush3.bf16.msra.mxu0 %v1559_v6 }
 0x1f3   : > { %v571_v36 = vmax.f32 %v516_v34, 0.0  ;;  %1561 = vmatprep.subr.bf16.mxu0 %v1803_v0 }
 0x1f4   : > { %v520_v37 = vpop.f32.mrb[6].mxu1 }
 0x1f5   : > { %v521_v38 = vadd.f32 %v520_v37, %v2049_v24  ;;  %v1334_v39 = vpop.f32.mrb[7].mxu1  ;;  %1401 = vmatmul.mubr.f32.gmra.mrb[30].mxu0 %v571_v36 }
 0x1f6   : > { %1403 = vmatprep.mubr.msk.f32.mxu0 %vm1804_vm0, %v1805_v1  ;;  %1563 = vmatpush3.bf16.msra.mxu0 %v1562_v10 }
 0x1f7   : > { %v572_v40 = vmax.f32 %v521_v38, 0.0  ;;  %1564 = vmatprep.subr.bf16.mxu0 %v1803_v0 }
 0x1f8   : > { %v525_v41 = vpop.f32.mrb[8].mxu1 }
 0x1f9   : > { %v526_v42 = vadd.f32 %v525_v41, %v2049_v24  ;;  %v1337_v43 = vpop.f32.mrb[9].mxu1  ;;  %1404 = vmatmul.mubr.f32.gmra.mrb[32].mxu0 %v572_v40 }
 0x1fa   : > { %1406 = vmatprep.mubr.msk.f32.mxu0 %vm1804_vm0, %v1805_v1  ;;  %1566 = vmatpush3.bf16.msra.mxu0 %v1565_v13 }
 0x1fb   : > { %v573_v44 = vmax.f32 %v526_v42, 0.0  ;;  %1567 = vmatprep.subr.bf16.mxu0 %v1803_v0 }
 0x1fc   : > { %v530_v45 = vpop.f32.mrb[10].mxu1 }
 0x1fd   : > { %v531_v46 = vadd.f32 %v530_v45, %v2049_v24  ;;  %v1340_v47 = vpop.f32.mrb[11].mxu1  ;;  %1407 = vmatmul.mubr.f32.gmra.mrb[34].mxu0 %v573_v44 }
 0x1fe   : > { %1409 = vmatprep.mubr.msk.f32.mxu0 %vm1804_vm0, %v1805_v1  ;;  %1569 = vmatpush3.bf16.msra.mxu0 %v1568_v16 }
 0x1ff   : > { %v574_v48 = vmax.f32 %v531_v46, 0.0  ;;  %1570 = vmatprep.subr.bf16.mxu0 %v1803_v0 }
 0x200   : > { %v535_v49 = vpop.f32.mrb[12].mxu1 }
 0x201   : > { %v536_v50 = vadd.f32 %v535_v49, %v2049_v24  ;;  %v1343_v51 = vpop.f32.mrb[13].mxu1  ;;  %1410 = vmatmul.mubr.f32.gmra.mrb[36].mxu0 %v574_v48 }
 0x202   : > { %1412 = vmatprep.mubr.msk.f32.mxu0 %vm1804_vm0, %v1805_v1  ;;  %1572 = vmatpush3.bf16.msra.mxu0 %v1571_v19  ;;  %v1577_v19 = vpack.c.bf16 %v246_v18, %v245_v17 }
 0x203   : > { %v575_v52 = vmax.f32 %v536_v50, 0.0  ;;  %1573 = vmatprep.subr.bf16.mxu0 %v1803_v0 }
 0x204   : > { %v540_v53 = vpop.f32.mrb[14].mxu1  ;;  %1594 = vmatpush3.bf16.msra.mxu1 %v1577_v19 }
 0x205   : > { %v541_v54 = vadd.f32 %v540_v53, %v2049_v24  ;;  %v1346_v55 = vpop.f32.mrb[15].mxu1  ;;  %1413 = vmatmul.mubr.f32.gmra.mrb[38].mxu0 %v575_v52 }
 0x206   : > { %1415 = vmatprep.mubr.msk.f32.mxu0 %vm1804_vm0, %v1805_v1  ;;  %1575 = vmatpush3.bf16.msra.mxu0 %v1574_v22 }
 0x207   : > { %v576_v56 = vmax.f32 %v541_v54, 0.0  ;;  %1576 = vmatprep.subr.bf16.mxu0 %v1803_v0 }
 0x208   : > { %v545_v57 = vpop.f32.mrb[16].mxu1 }
 0x209   : > { %v546_v58 = vadd.f32 %v545_v57, %v2049_v24  ;;  %v1349_v59 = vpop.f32.mrb[17].mxu1  ;;  %1416 = vmatmul.mubr.f32.gmra.mrb[40].mxu0 %v576_v56 }
 0x20a   : > { %1418 = vmatprep.mubr.msk.f32.mxu0 %vm1804_vm0, %v1805_v1  ;;  %1578 = vmatpush3.bf16.msra.mxu0 %v1577_v19 }
 0x20b   : > { %v577_v60 = vmax.f32 %v546_v58, 0.0 }
 0x20c   : > { %v550_v61 = vpop.f32.mrb[18].mxu1 }
 0x20d   : > { %v551_v62 = vadd.f32 %v550_v61, %v2049_v24  ;;  %v1352_v63 = vpop.f32.mrb[19].mxu1  ;;  %1419 = vmatmul.mubr.f32.gmra.mrb[42].mxu0 %v577_v60 }
 0x20e   : > { %1421 = vmatprep.mubr.msk.f32.mxu0 %vm1804_vm0, %v1805_v1 }
 0x20f   : > { %v578_v2 = vmax.f32 %v551_v62, 0.0 }
 0x210   : > { %v555_v3 = vpop.f32.mrb[20].mxu1 }
 0x211   : > { %v556_v0 = vadd.f32 %v555_v3, %v2049_v24  ;;  %v1355_v6 = vpop.f32.mrb[21].mxu1  ;;  %1422 = vmatmul.mubr.f32.gmra.mrb[44].mxu0 %v578_v2 }
 0x212   : > { %1424 = vmatprep.mubr.msk.f32.mxu0 %vm1804_vm0, %v1805_v1 }
 0x213   : > { %v579_v8 = vmax.f32 %v556_v0, 0.0 }
 0x214   : > { %v560_v9 = vpop.f32.mrb[22].mxu1 }
 0x215   : > { %v561_v10 = vadd.f32 %v560_v9, %v2049_v24  ;;  %v1358_v11 = vpop.f32.mrb[23].mxu1  ;;  %1425 = vmatmul.mubr.f32.gmra.mrb[46].mxu0 %v579_v8 }
 0x216   : > { %1427 = vmatprep.mubr.msk.f32.mxu0 %vm1804_vm0, %v1805_v1 }
 0x217   : > { %v580_v12 = vmax.f32 %v561_v10, 0.0 }
 0x218   : > { %v565_v13 = vpop.f32.mrb[24].mxu1 }
 0x219   : > { %v566_v14 = vadd.f32 %v565_v13, %v2049_v24  ;;  %v1361_v15 = vpop.f32.mrb[25].mxu1  ;;  %1428 = vmatmul.mubr.f32.gmra.mrb[48].mxu0 %v580_v12 }
 0x21a   : > { %1430 = vmatprep.mubr.msk.f32.mxu0 %vm1804_vm0, %v1805_v1  ;;  %v2138_v15 = vand.u32 127, %v248_v4 }
 0x21b   : > { %v581_v16 = vmax.f32 %v566_v14, 0.0  ;;  %v731_v14 = vsub.s32 3, %v1993_v5 }
 0x21c   : > { %vm865_vm2 = vcmp.lt.s32.totalorder %v2138_v15, 8 }
 0x21d   : > { %1431 = vmatmul.mubr.f32.gmra.mrb[50].mxu0 %v581_v16  ;;  %v2141_v16 = vrot.slane %v1996_v7, %v731_v14 }
 0x21e   : > { %1465 = vmatprep.mubr.msk.f32.mxu0 %vm1804_vm0, %v1805_v1 }
 0x2c0   : > { %v652_v22 = vpop.f32.mrb[26].mxu0 }
 0x2c1   : > { %v653_v23 = vadd.f32 %v652_v22, %v2099_v21  ;;  %v1396_v24 = vpop.f32.mrb[27].mxu0 }
 0x2c3   : > { %v716_v25 = vmax.f32 %v653_v23, 0.0 }
 0x2c4   : > { %v657_v26 = vpop.f32.mrb[28].mxu0 }
 0x2c5   : > { %v658_v27 = vadd.f32 %v657_v26, %v2099_v21  ;;  %v1399_v28 = vpop.f32.mrb[29].mxu0  ;;  %1466 = vmatmul.mubr.f32.vlgmr.msra.gmra.mrb[52].mxu0 %v716_v25 }
 0x2c6   : > { %1468 = vmatprep.mubr.msk.f32.mxu0 %vm1804_vm0, %v1805_v1 }
 0x2c7   : > { %v717_v29 = vmax.f32 %v658_v27, 0.0 }
 0x2c8   : > { %v662_v30 = vpop.f32.mrb[30].mxu0 }
 0x2c9   : > { %v663_v31 = vadd.f32 %v662_v30, %v2099_v21  ;;  %v1402_v32 = vpop.f32.mrb[31].mxu0  ;;  %1469 = vmatmul.mubr.f32.gmra.mrb[54].mxu0 %v717_v29 }
 0x2ca   : > { %1471 = vmatprep.mubr.msk.f32.mxu0 %vm1804_vm0, %v1805_v1 }
 0x2cb   : > { %v718_v33 = vmax.f32 %v663_v31, 0.0 }
 0x2cc   : > { %v667_v34 = vpop.f32.mrb[32].mxu0 }
 0x2cd   : > { %v668_v35 = vadd.f32 %v667_v34, %v2099_v21  ;;  %v1405_v36 = vpop.f32.mrb[33].mxu0  ;;  %1472 = vmatmul.mubr.f32.gmra.mrb[56].mxu0 %v718_v33 }
 0x2cf   : > { %v719_v37 = vmax.f32 %v668_v35, 0.0 }
 0x2d0   : > { %v672_v38 = vpop.f32.mrb[34].mxu0 }
 0x2d1   : > { %v673_v39 = vadd.f32 %v672_v38, %v2099_v21  ;;  %v1408_v40 = vpop.f32.mrb[35].mxu0  ;;  %1475 = vmatmul.mubr.f32.vlgmr.msra.gmra.mrb[26].mxu1 %v719_v37 }
 0x2d2   : > { %1477 = vmatprep.mubr.msk.f32.mxu1 %vm1804_vm0, %v1805_v1 }
 0x2d3   : > { %v720_v41 = vmax.f32 %v673_v39, 0.0 }
 0x2d4   : > { %v677_v42 = vpop.f32.mrb[36].mxu0 }
 0x2d5   : > { %v678_v43 = vadd.f32 %v677_v42, %v2099_v21  ;;  %v1411_v44 = vpop.f32.mrb[37].mxu0  ;;  %1478 = vmatmul.mubr.f32.gmra.mrb[28].mxu1 %v720_v41 }
 0x2d6   : > { %1480 = vmatprep.mubr.msk.f32.mxu1 %vm1804_vm0, %v1805_v1 }
 0x2d7   : > { %v721_v45 = vmax.f32 %v678_v43, 0.0 }
 0x2d8   : > { %v682_v46 = vpop.f32.mrb[38].mxu0 }
 0x2d9   : > { %v683_v47 = vadd.f32 %v682_v46, %v2099_v21  ;;  %v1414_v48 = vpop.f32.mrb[39].mxu0  ;;  %1481 = vmatmul.mubr.f32.gmra.mrb[30].mxu1 %v721_v45 }
 0x2da   : > { %1483 = vmatprep.mubr.msk.f32.mxu1 %vm1804_vm0, %v1805_v1 }
 0x2db   : > { %v722_v49 = vmax.f32 %v683_v47, 0.0 }
 0x2dc   : > { %v687_v50 = vpop.f32.mrb[40].mxu0 }
 0x2dd   : > { %v688_v51 = vadd.f32 %v687_v50, %v2099_v21  ;;  %v1417_v52 = vpop.f32.mrb[41].mxu0  ;;  %1484 = vmatmul.mubr.f32.gmra.mrb[32].mxu1 %v722_v49 }
 0x2de   : > { %1486 = vmatprep.mubr.msk.f32.mxu1 %vm1804_vm0, %v1805_v1 }
 0x2df   : > { %v723_v53 = vmax.f32 %v688_v51, 0.0 }
 0x2e0   : > { %v692_v54 = vpop.f32.mrb[42].mxu0 }
 0x2e1   : > { %v693_v55 = vadd.f32 %v692_v54, %v2099_v21  ;;  %v1420_v56 = vpop.f32.mrb[43].mxu0  ;;  %1487 = vmatmul.mubr.f32.gmra.mrb[34].mxu1 %v723_v53 }
 0x2e2   : > { %1489 = vmatprep.mubr.msk.f32.mxu1 %vm1804_vm0, %v1805_v1 }
 0x2e3   : > { %v724_v57 = vmax.f32 %v693_v55, 0.0 }
 0x2e4   : > { %v697_v58 = vpop.f32.mrb[44].mxu0 }
 0x2e5   : > { %v698_v59 = vadd.f32 %v697_v58, %v2099_v21  ;;  %v1423_v60 = vpop.f32.mrb[45].mxu0  ;;  %1490 = vmatmul.mubr.f32.gmra.mrb[36].mxu1 %v724_v57 }
 0x2e6   : > { %1492 = vmatprep.mubr.msk.f32.mxu1 %vm1804_vm0, %v1805_v1 }
 0x2e7   : > { %v725_v61 = vmax.f32 %v698_v59, 0.0 }
 0x2e8   : > { %v702_v62 = vpop.f32.mrb[46].mxu0 }
 0x2e9   : > { %v703_v63 = vadd.f32 %v702_v62, %v2099_v21  ;;  %v1426_v2 = vpop.f32.mrb[47].mxu0  ;;  %1493 = vmatmul.mubr.f32.gmra.mrb[38].mxu1 %v725_v61 }
 0x2ea   : > { %1495 = vmatprep.mubr.msk.f32.mxu1 %vm1804_vm0, %v1805_v1 }
 0x2eb   : > { %v726_v3 = vmax.f32 %v703_v63, 0.0 }
 0x2ec   : > { %v707_v0 = vpop.f32.mrb[48].mxu0 }
 0x2ed   : > { %v708_v6 = vadd.f32 %v707_v0, %v2099_v21  ;;  %v1429_v8 = vpop.f32.mrb[49].mxu0  ;;  %1496 = vmatmul.mubr.f32.gmra.mrb[40].mxu1 %v726_v3 }
 0x2ee   : > { %1498 = vmatprep.mubr.msk.f32.mxu1 %vm1804_vm0, %v1805_v1 }
 0x2ef   : > { %v727_v9 = vmax.f32 %v708_v6, 0.0 }
 0x2f0   : > { %v712_v10 = vpop.f32.mrb[50].mxu0 }
 0x2f1   : > { %v713_v11 = vadd.f32 %v712_v10, %v2099_v21  ;;  %v1432_v12 = vpop.f32.mrb[51].mxu0  ;;  %1499 = vmatmul.mubr.f32.gmra.mrb[42].mxu1 %v727_v9 }
 0x2f2   : > { %1501 = vmatprep.mubr.msk.f32.mxu1 %vm1804_vm0, %v1805_v1 }
 0x2f3   : > { %v728_v13 = vmax.f32 %v713_v11, 0.0 }
 0x2f5   : > { %1502 = vmatmul.mubr.f32.gmra.mrb[44].mxu1 %v728_v13 }
 0x398   : > { %v799_v17 = vpop.f32.mrb[52].mxu0 }
 0x399   : > { %v2145_v18 = vadd.f32 %v799_v17, %v2141_v16  ;;  %v1467_v19 = vpop.f32.mrb[53].mxu0 }
 0x39b   : > { %v2150_v1 = vsel %vm865_vm2, %v2145_v18, -1e+30 }
 0x39c   : > { %881 = vmax.xlane.f32.xlu0 %v2150_v1  ;;  %v804_v5 = vpop.f32.mrb[54].mxu0 }
 0x39d   : > { %v2154_v4 = vadd.f32 %v804_v5, %v2141_v16  ;;  %v1470_v7 = vpop.f32.mrb[55].mxu0 }
 0x39f   : > { %v2159_v20 = vsel %vm865_vm2, %v2154_v4, -1e+30 }
 0x3a0   : > { %883 = vmax.xlane.f32.xlu0 %v2159_v20  ;;  %v809_v21 = vpop.f32.mrb[56].mxu0 }
 0x3a1   : > { %v2163_v22 = vadd.f32 %v809_v21, %v2141_v16  ;;  %v1473_v23 = vpop.f32.mrb[57].mxu0 }
 0x3a3   : > { %v2168_v24 = vsel %vm865_vm2, %v2163_v22, -1e+30 }
 0x3a4   : > { %v814_v25 = vpop.f32.mrb[26].mxu1  ;;  %885 = vmax.xlane.f32.xlu1 %v2168_v24 }
 0x3a5   : > { %v2172_v26 = vadd.f32 %v814_v25, %v2141_v16  ;;  %v1476_v27 = vpop.f32.mrb[27].mxu1 }
 0x3a7   : > { %v2177_v28 = vsel %vm865_vm2, %v2172_v26, -1e+30 }
 0x3a8   : > { %v819_v29 = vpop.f32.mrb[28].mxu1  ;;  %887 = vmax.xlane.f32.xlu1 %v2177_v28 }
 0x3a9   : > { %v2181_v30 = vadd.f32 %v819_v29, %v2141_v16  ;;  %v1479_v31 = vpop.f32.mrb[29].mxu1 }
 0x3ab   : > { %v2186_v32 = vsel %vm865_vm2, %v2181_v30, -1e+30 }
 0x3ac   : > { %v824_v33 = vpop.f32.mrb[30].mxu1  ;;  %889 = vmax.xlane.f32.xlu0 %v2186_v32 }
 0x3ad   : > { %v2190_v34 = vadd.f32 %v824_v33, %v2141_v16  ;;  %v1482_v35 = vpop.f32.mrb[31].mxu1 }
 0x3af   : > { %v2195_v36 = vsel %vm865_vm2, %v2190_v34, -1e+30 }
 0x3b0   : > { %v829_v37 = vpop.f32.mrb[32].mxu1  ;;  %891 = vmax.xlane.f32.xlu1 %v2195_v36 }
 0x3b1   : > { %v2199_v38 = vadd.f32 %v829_v37, %v2141_v16  ;;  %v1485_v39 = vpop.f32.mrb[33].mxu1 }
 0x3b3   : > { %v2204_v40 = vsel %vm865_vm2, %v2199_v38, -1e+30 }
 0x3b4   : > { %v834_v41 = vpop.f32.mrb[34].mxu1  ;;  %893 = vmax.xlane.f32.xlu0 %v2204_v40 }
 0x3b5   : > { %v2208_v42 = vadd.f32 %v834_v41, %v2141_v16  ;;  %v1488_v43 = vpop.f32.mrb[35].mxu1 }
 0x3b7   : > { %v2213_v44 = vsel %vm865_vm2, %v2208_v42, -1e+30 }
 0x3b8   : > { %v839_v45 = vpop.f32.mrb[36].mxu1  ;;  %895 = vmax.xlane.f32.xlu1 %v2213_v44 }
 0x3b9   : > { %v2217_v46 = vadd.f32 %v839_v45, %v2141_v16  ;;  %v1491_v47 = vpop.f32.mrb[37].mxu1 }
 0x3bb   : > { %v2222_v48 = vsel %vm865_vm2, %v2217_v46, -1e+30 }
 0x3bc   : > { %v844_v49 = vpop.f32.mrb[38].mxu1  ;;  %897 = vmax.xlane.f32.xlu0 %v2222_v48 }
 0x3bd   : > { %v2226_v50 = vadd.f32 %v844_v49, %v2141_v16  ;;  %v1494_v51 = vpop.f32.mrb[39].mxu1 }
 0x3bf   : > { %v2231_v52 = vsel %vm865_vm2, %v2226_v50, -1e+30 }
 0x3c0   : > { %v849_v53 = vpop.f32.mrb[40].mxu1  ;;  %899 = vmax.xlane.f32.xlu1 %v2231_v52 }
 0x3c1   : > { %v2235_v54 = vadd.f32 %v849_v53, %v2141_v16  ;;  %v1497_v55 = vpop.f32.mrb[41].mxu1 }
 0x3c3   : > { %v2240_v56 = vsel %vm865_vm2, %v2235_v54, -1e+30 }
 0x3c4   : > { %v854_v57 = vpop.f32.mrb[42].mxu1  ;;  %901 = vmax.xlane.f32.xlu0 %v2240_v56 }
 0x3c5   : > { %v2244_v58 = vadd.f32 %v854_v57, %v2141_v16  ;;  %v1500_v59 = vpop.f32.mrb[43].mxu1 }
 0x3c7   : > { %v2249_v60 = vsel %vm865_vm2, %v2244_v58, -1e+30 }
 0x3c8   : > { %v859_v61 = vpop.f32.mrb[44].mxu1  ;;  %903 = vmax.xlane.f32.xlu1 %v2249_v60 }
 0x3c9   : > { %v2253_v62 = vadd.f32 %v859_v61, %v2141_v16  ;;  %v1503_v63 = vpop.f32.mrb[45].mxu1 }
 0x3cb   : > { %v2258_v2 = vsel %vm865_vm2, %v2253_v62, -1e+30 }
 0x3cc   : > { %905 = vmax.xlane.f32.xlu0 %v2258_v2 }
 0x429   : > { %v882_v3 = vpop.xlane.xlu0 %881 }
 0x42a   : > { %v907_v0 = vsub.f32 %v2150_v1, %v882_v3 }
 0x42c   : > { %v920_v6 = vmul.f32 1.442695, %v907_v0 }
 0x42d   : > { %v884_v8 = vpop.xlane.xlu0 %883 }
 0x42e   : > { %1652 = vpow2.f32 %v920_v6  ;;  %v908_v9 = vsub.f32 %v2159_v20, %v884_v8 }
 0x430   : > { %v922_v10 = vmul.f32 1.442695, %v908_v9 }
 0x431   : > { %v886_v11 = vpop.xlane.xlu1 %885 }
 0x432   : > { %1654 = vpow2.f32 %v922_v10  ;;  %v909_v12 = vsub.f32 %v2168_v24, %v886_v11 }
 0x434   : > { %v924_v13 = vmul.f32 1.442695, %v909_v12 }
 0x435   : > { %v888_v14 = vpop.xlane.xlu1 %887 }
 0x436   : > { %1656 = vpow2.f32 %v924_v13  ;;  %v910_v16 = vsub.f32 %v2177_v28, %v888_v14 }
 0x438   : > { %v2266_v17 = vpop.eup %1652  ;;  %v926_v19 = vmul.f32 1.442695, %v910_v16 }
 0x439   : > { %v890_v5 = vpop.xlane.xlu0 %889  ;;  %946 = vadd.xlane.f32.xlu1 %v2266_v17 }
 0x43a   : > { %1658 = vpow2.f32 %v926_v19  ;;  %v911_v1 = vsub.f32 %v2186_v32, %v890_v5 }
 0x43c   : > { %v2270_v7 = vpop.eup %1654  ;;  %v928_v20 = vmul.f32 1.442695, %v911_v1 }
 0x43d   : > { %948 = vadd.xlane.f32.xlu0 %v2270_v7  ;;  %v892_v21 = vpop.xlane.xlu1 %891 }
 0x43e   : > { %1660 = vpow2.f32 %v928_v20  ;;  %v912_v23 = vsub.f32 %v2195_v36, %v892_v21 }
 0x440   : > { %v2274_v24 = vpop.eup %1656  ;;  %v930_v25 = vmul.f32 1.442695, %v912_v23 }
 0x441   : > { %v894_v27 = vpop.xlane.xlu0 %893  ;;  %950 = vadd.xlane.f32.xlu1 %v2274_v24 }
 0x442   : > { %1662 = vpow2.f32 %v930_v25  ;;  %v913_v28 = vsub.f32 %v2204_v40, %v894_v27 }
 0x444   : > { %v2278_v29 = vpop.eup %1658  ;;  %v932_v31 = vmul.f32 1.442695, %v913_v28 }
 0x445   : > { %952 = vadd.xlane.f32.xlu0 %v2278_v29  ;;  %v896_v32 = vpop.xlane.xlu1 %895 }
 0x446   : > { %1664 = vpow2.f32 %v932_v31  ;;  %v914_v33 = vsub.f32 %v2213_v44, %v896_v32 }
 0x448   : > { %v2282_v35 = vpop.eup %1660  ;;  %v934_v36 = vmul.f32 1.442695, %v914_v33 }
 0x449   : > { %v898_v37 = vpop.xlane.xlu0 %897  ;;  %954 = vadd.xlane.f32.xlu1 %v2282_v35 }
 0x44a   : > { %1666 = vpow2.f32 %v934_v36  ;;  %v915_v39 = vsub.f32 %v2222_v48, %v898_v37 }
 0x44c   : > { %v2286_v41 = vpop.eup %1662  ;;  %v936_v40 = vmul.f32 1.442695, %v915_v39 }
 0x44d   : > { %956 = vadd.xlane.f32.xlu0 %v2286_v41  ;;  %v900_v43 = vpop.xlane.xlu1 %899 }
 0x44e   : > { %1668 = vpow2.f32 %v936_v40  ;;  %v916_v45 = vsub.f32 %v2231_v52, %v900_v43 }
 0x450   : > { %v2290_v47 = vpop.eup %1664  ;;  %v938_v44 = vmul.f32 1.442695, %v916_v45 }
 0x451   : > { %v902_v49 = vpop.xlane.xlu0 %901  ;;  %958 = vadd.xlane.f32.xlu1 %v2290_v47 }
 0x452   : > { %1670 = vpow2.f32 %v938_v44  ;;  %v917_v51 = vsub.f32 %v2240_v56, %v902_v49 }
 0x454   : > { %v2294_v53 = vpop.eup %1666  ;;  %v940_v48 = vmul.f32 1.442695, %v917_v51 }
 0x455   : > { %960 = vadd.xlane.f32.xlu0 %v2294_v53  ;;  %v904_v55 = vpop.xlane.xlu1 %903 }
 0x456   : > { %1672 = vpow2.f32 %v940_v48  ;;  %v918_v57 = vsub.f32 %v2249_v60, %v904_v55 }
 0x458   : > { %v2298_v59 = vpop.eup %1668  ;;  %v942_v52 = vmul.f32 1.442695, %v918_v57 }
 0x459   : > { %v906_v61 = vpop.xlane.xlu0 %905  ;;  %962 = vadd.xlane.f32.xlu1 %v2298_v59 }
 0x45a   : > { %1674 = vpow2.f32 %v942_v52  ;;  %v919_v63 = vsub.f32 %v2258_v2, %v906_v61 }
 0x45c   : > { %v2302_v56 = vpop.eup %1670  ;;  %v944_v3 = vmul.f32 1.442695, %v919_v63 }
 0x45d   : > { %964 = vadd.xlane.f32.xlu0 %v2302_v56 }
 0x45e   : > { %1676 = vpow2.f32 %v944_v3 }
 0x460   : > { %v2305_v0 = vpop.eup %1672 }
 0x461   : > { %966 = vadd.xlane.f32.xlu1 %v2305_v0 }
 0x464   : > { %v2308_v60 = vpop.eup %1674 }
 0x465   : > { %968 = vadd.xlane.f32.xlu0 %v2308_v60 }
 0x468   : > { %v2311_v6 = vpop.eup %1676 }
 0x469   : > { %970 = vadd.xlane.f32.xlu1 %v2311_v6 }
 0x4c6   : > { %v947_v8 = vpop.xlane.xlu1 %946 }
 0x4c7   : > { %1678 = vrcp.f32 %v947_v8 }
 0x4ca   : > { %v949_v2 = vpop.xlane.xlu0 %948 }
 0x4cb   : > { %1680 = vrcp.f32 %v949_v2 }
 0x4ce   : > { %v951_v9 = vpop.xlane.xlu1 %950 }
 0x4cf   : > { %1682 = vrcp.f32 %v951_v9 }
 0x4d1   : > { %v1679_v10 = vpop.eup %1678 }
 0x4d2   : > { %v973_v11 = vmul.f32 %v1679_v10, %v2266_v17  ;;  %v953_v12 = vpop.xlane.xlu0 %952 }
 0x4d3   : > { %1684 = vrcp.f32 %v953_v12 }
 0x4d4   : > { %v998_v13 = vsel %vm865_vm2, %v973_v11, %v2145_v18 }
 0x4d5   : > { %v1681_v14 = vpop.eup %1680  ;;  %1011 = vst [vmem:[%s2320_s26] sm:$0xff] %v998_v13 }
 0x4d6   : > { %v975_v16 = vmul.f32 %v1681_v14, %v2270_v7  ;;  %v955_v19 = vpop.xlane.xlu1 %954 }
 0x4d7   : > { %1686 = vrcp.f32 %v955_v19 }
 0x4d8   : > { %v999_v17 = vsel %vm865_vm2, %v975_v16, %v2154_v4 }
 0x4d9   : > { %v1683_v5 = vpop.eup %1682  ;;  %1012 = vst [vmem:[%s2320_s26 + $0x8] sm:$0xff] %v999_v17 }
 0x4da   : > { %v977_v18 = vmul.f32 %v1683_v5, %v2274_v24  ;;  %v957_v1 = vpop.xlane.xlu0 %956 }
 0x4db   : > { %1688 = vrcp.f32 %v957_v1 }
 0x4dc   : > { %v1000_v20 = vsel %vm865_vm2, %v977_v18, %v2163_v22 }
 0x4dd   : > { %v1685_v21 = vpop.eup %1684  ;;  %1013 = vst [vmem:[%s2320_s26 + $0x10] sm:$0xff] %v1000_v20 }
 0x4de   : > { %v979_v7 = vmul.f32 %v1685_v21, %v2278_v29  ;;  %v959_v23 = vpop.xlane.xlu1 %958 }
 0x4df   : > { %1690 = vrcp.f32 %v959_v23 }
 0x4e0   : > { %v1001_v4 = vsel %vm865_vm2, %v979_v7, %v2172_v26 }
 0x4e1   : > { %v1687_v25 = vpop.eup %1686  ;;  %1014 = vst [vmem:[%s2320_s26 + $0x18] sm:$0xff] %v1001_v4 }
 0x4e2   : > { %v981_v24 = vmul.f32 %v1687_v25, %v2282_v35  ;;  %v961_v27 = vpop.xlane.xlu0 %960 }
 0x4e3   : > { %1692 = vrcp.f32 %v961_v27 }
 0x4e4   : > { %v1002_v22 = vsel %vm865_vm2, %v981_v24, %v2181_v30 }
 0x4e5   : > { %v1689_v28 = vpop.eup %1688  ;;  %1015 = vst [vmem:[%s2320_s26 + $0x20] sm:$0xff] %v1002_v22 }
 0x4e6   : > { %v983_v29 = vmul.f32 %v1689_v28, %v2286_v41  ;;  %v963_v31 = vpop.xlane.xlu1 %962 }
 0x4e7   : > { %1694 = vrcp.f32 %v963_v31 }
 0x4e8   : > { %v1003_v26 = vsel %vm865_vm2, %v983_v29, %v2190_v34 }
 0x4e9   : > { %v1691_v32 = vpop.eup %1690  ;;  %1016 = vst [vmem:[%s2320_s26 + $0x28] sm:$0xff] %v1003_v26 }
 0x4ea   : > { %v985_v33 = vmul.f32 %v1691_v32, %v2290_v47  ;;  %v965_v35 = vpop.xlane.xlu0 %964 }
 0x4eb   : > { %1696 = vrcp.f32 %v965_v35 }
 0x4ec   : > { %v1004_v30 = vsel %vm865_vm2, %v985_v33, %v2199_v38 }
 0x4ed   : > { %v1693_v36 = vpop.eup %1692  ;;  %1017 = vst [vmem:[%s2320_s26 + $0x30] sm:$0xff] %v1004_v30 }
 0x4ee   : > { %v987_v37 = vmul.f32 %v1693_v36, %v2294_v53  ;;  %v967_v39 = vpop.xlane.xlu1 %966 }
 0x4ef   : > { %1698 = vrcp.f32 %v967_v39 }
 0x4f0   : > { %v1005_v34 = vsel %vm865_vm2, %v987_v37, %v2208_v42 }
 0x4f1   : > { %v1695_v41 = vpop.eup %1694  ;;  %1018 = vst [vmem:[%s2320_s26 + $0x38] sm:$0xff] %v1005_v34 }
 0x4f2   : > { %v989_v40 = vmul.f32 %v1695_v41, %v2298_v59  ;;  %v969_v43 = vpop.xlane.xlu0 %968 }
 0x4f3   : > { %1700 = vrcp.f32 %v969_v43 }
 0x4f4   : > { %v1006_v38 = vsel %vm865_vm2, %v989_v40, %v2217_v46 }
 0x4f5   : > { %v1697_v45 = vpop.eup %1696  ;;  %1019 = vst [vmem:[%s2320_s26 + $0x40] sm:$0xff] %v1006_v38 }
 0x4f6   : > { %v991_v47 = vmul.f32 %v1697_v45, %v2302_v56  ;;  %v971_v44 = vpop.xlane.xlu1 %970 }
 0x4f7   : > { %1702 = vrcp.f32 %v971_v44 }
 0x4f8   : > { %v1007_v42 = vsel %vm865_vm2, %v991_v47, %v2226_v50 }
 0x4f9   : > { %v1699_v49 = vpop.eup %1698  ;;  %1020 = vst [vmem:[%s2320_s26 + $0x48] sm:$0xff] %v1007_v42 }
 0x4fa   : > { %v993_v51 = vmul.f32 %v1699_v49, %v2305_v0 }
 0x4fc   : > { %v1008_v46 = vsel %vm865_vm2, %v993_v51, %v2235_v54 }
 0x4fd   : > { %v1701_v53 = vpop.eup %1700  ;;  %1021 = vst [vmem:[%s2320_s26 + $0x50] sm:$0xff] %v1008_v46 }
 0x4fe   : > { %v995_v48 = vmul.f32 %v1701_v53, %v2308_v60 }
 0x4ff   : > { %1031 = sbr.rel (!%p2458_p6) target bundleno = 1314 (0x522), region = 36 }
 0x500   : > { %v1009_v55 = vsel %vm865_vm2, %v995_v48, %v2244_v58 }
 0x501   : > { %v1703_v57 = vpop.eup %1702  ;;  %1022 = vst [vmem:[%s2320_s26 + $0x58] sm:$0xff] %v1009_v55 }
 0x502   : > { %v997_v50 = vmul.f32 %v1703_v57, %v2311_v6 }
 0x504   : > { %v1010_v59 = vsel %vm865_vm2, %v997_v50, %v2253_v62 }
 0x505   : > { %1023 = vst [vmem:[%s2320_s26 + $0x60] sm:$0xff] %v1010_v59 }
 0x506   : > { %s2465_s28 = smov (!%p1034_p9, %s1033_s28), 13 }
 0x507   : > { %s2390_s29 = sshll.u32 %s2465_s28, 7 }
 0x508   : > { %s1038_s30 = ssub.s32 1664, %s2390_s29 }
 0x509   : > { %1039 = vsyncadd %s2385_s27, %s1038_s30  ;;  %p1139_p10 = scmp.ne.s32.totalorder %s2390_s29, 0  ;;  %s1145_s3 = smul.u32 1664, %s1845_s13 }
 0x50a   : > { %s1044_s4 = sshll.u32 %s2320_s26, 4  ;;  %s1806_s8 = smov [#allocation5]   ;;  %s2402_s4 = int_to_ptr.vmem [resolvable:$true] %s1044_s4 }
 0x50b   : > { %s2400_s6 = scalar_lea.hbm %s2448_s2, %s1145_s3  ;;  %s1732_s7 = scalar_lea.vmem %s2402_s4, %s2390_s29 }
 0x50c   : > { %p1733_p12 = scmp.ne.s32.totalorder %s2402_s4, %s1732_s7  ;;  %s1736_s14 = sshll.u32 %s1806_s8, 4  ;;  %s1737_s14 = int_to_ptr.vmem [resolvable:$false] %s1736_s14 }
 0x50d   : > { %s1738_s13 = scalar_lea.vmem %s1737_s14, 3328  ;;  %p1739_p4 = scmp.lt.s32.totalorder %s2402_s4, %s1737_s14 }
 0x50e   : > { %p1734_p2 = pnand %p1733_p12, %p1139_p10  ;;  %p1740_p7 = scmp.lt.s32.totalorder %s1738_s13, %s1732_s7 }
 0x510   : > { %p1735_p3 = pneg %p1734_p2  ;;  %p1741_p8 = por %p1740_p7, %p1739_p4 }
 0x512   : > { %p1742_p11 = pnand %p1741_p8, %p1735_p3 }
 0x514   : > { %1745 = shalt.err (!%p1742_p11)
}
 0x515   : > { %s1746_s16 = scalar_lea.hbm %s2400_s6, %s2390_s29  ;;  %s1750_s22 = scalar_lea.hbm %s2448_s2, 3200 }
 0x516   : > { %p1747_p13 = scmp.ne.s32.totalorder %s2400_s6, %s1746_s16  ;;  %p1751_p5 = scmp.lt.u32.totalorder %s2400_s6, %s2448_s2 }
 0x517   : > { %p1752_p6 = scmp.lt.u32.totalorder %s1750_s22, %s1746_s16  ;;  %p1754_p12 = scmp.lt.u32.totalorder %s1746_s16, %s2400_s6 }
 0x518   : > { %p1748_p1 = pnand %p1747_p13, %p1139_p10 }
 0x519   : > { %p1753_p9 = por %p1752_p6, %p1751_p5 }
 0x51a   : > { %p1749_p0 = pneg %p1748_p1 }
 0x51b   : > { %p1755_p2 = por %p1754_p12, %p1753_p9 }
 0x51d   : > { %p1756_p3 = pnand %p1755_p2, %p1749_p0 }
 0x51f   : > { %1759 = shalt.err (!%p1756_p3)
}
 0x520   : > { %s1807_s25 = smov 128   ;;  %s1808_s26 = smov 8  }
 0x521   : > { %1050 = dma.vmem_to_hbm [thread:$0]  (%p1139_p10), %s2402_s4, %s2390_s29, %s2400_s6, %s2385_s27, %s1807_s25, %s1807_s25, %s1808_s26  }
 0x522 PF: > { %p1611_p4 = scmp.ge.s32.totalorder %s1798_s12, 2  ;;  %s1059_s28 = sand.u32 1, %s1786_s9  }
 0x523   : > { %p2459_p7 = scmp.ne.s32.totalorder %s2452_s20, 0  ;;  %s1060_s30 = scalar_lea.sflag [#allocation4], %s1059_s28 }
 0x525   : > { %p1606_p8 = pnand %p1611_p4, %p2459_p7 }
 0x527   : > { %1781 = dma.done.wait (!%p1606_p8), %s1060_s30, 1664  }
 0x528   : > { %1783 = vsyncadd (!%p1606_p8), %s1060_s30, 4294965632  ;;  %p13_p11 = scmp.ge.s32.totalorder %s1849_s15, 4   ;;  %s2460_s9 = smov %s1790_s10 }
 0x529   : > { %s2461_s10 = smov %s1794_s11  ;;  %s2462_s11 = smov %s1860_s18 }
 0x52a   : > { %s2463_s12 = smov %s1849_s15  ;;  %15 = sbr.rel (!%p13_p11) target bundleno = 4 (0x4), region = 68 }
 0x531   :  { %1065 = vsyncpa [#allocation3], 1 }
 0x532   :  { %1067 = vsyncpa [#allocation3 + $0x1], 1 }
 0x533   :  { %1068 = vsyncpa [#allocation4], 1 }
 0x534   :  { %1070 = vsyncpa [#allocation4 + $0x1], 1 }

</bundles_post_ra>
